<compile_context>
chip_gen: v7x
topology: tpu7x:2x2x1
jax: 0.10.0
libtpu: 0.0.40
codegen_flags: <defaults>
</compile_context>

<pallas_src>
import jax
import jax.numpy as jnp
from jax.experimental import pallas as pl
from jax.experimental.pallas import tpu as pltpu

_LANE = 128


def _round_up(x, m):
    return ((x + m - 1) // m) * m


def _linear_kernel(x_ref, w_ref, b_ref, o_ref):
    # x_ref: (tm, K)   w_ref: (K, N)   b_ref: (1, N)   o_ref: (tm, N)
    acc = jnp.dot(x_ref[...], w_ref[...], preferred_element_type=jnp.float32)
    o_ref[...] = (acc + b_ref[...].astype(jnp.float32)).astype(o_ref.dtype)


def init_data_embedding_params(weight, bias):
    """One-time weight prep, hoisted out of the per-call path.

    weight: (d_model, c_in)  -- PyTorch nn.Linear layout
    bias:   (d_model,)
    """
    d_model, c_in = weight.shape
    w_t = weight.T                        # (c_in, d_model): done ONCE at init
    params = {
        "c_in": int(c_in),
        "d_model": int(d_model),
        "w": w_t,
        "b": bias.reshape(1, d_model),
        "r": 1,
        "w_slab": None,
        "b_slab": None,
    }
    # Lane-dense-output weights: replicate w block-diagonally so the kernel's
    # output last dim is exactly 128 (unmasked vst) when d_model < 128.
    if d_model < _LANE and _LANE % d_model == 0:
        r = _LANE // d_model
        w_bd = jnp.zeros((r * c_in, r * d_model), w_t.dtype)
        for t in range(r):
            w_bd = w_bd.at[t * c_in:(t + 1) * c_in,
                           t * d_model:(t + 1) * d_model].set(w_t)
        params["r"] = r
        params["w_slab"] = w_bd
        params["b_slab"] = jnp.tile(bias, r).reshape(1, r * d_model)
    return params


def _pick_tile(Mk, Kk, Nk, in_itemsize, out_itemsize,
               budget_bytes=48 * 1024 * 1024):
    """Largest row tile (<=1024) that (a) keeps >= 2 grid steps so both v7x
    TensorCores get work and (b) fits a v7x-safe VMEM budget with
    double-buffered x / out tiles plus the resident weight."""
    tm = max(8, min(1024, _round_up(pl.cdiv(Mk, 2), 8)))

    def vmem_bytes(t):
        resident = Kk * Nk * in_itemsize + Nk * 4
        streamed = 2 * t * Kk * in_itemsize + 2 * t * Nk * out_itemsize
        return resident + streamed

    while tm > 8 and vmem_bytes(tm) > budget_bytes:
        tm = max(8, _round_up(tm // 2, 8))
    return tm, vmem_bytes(tm)


def data_embedding_forward(x, params):
    """Pallas equivalent of DataEmbedding.forward (eval mode).

    x: (B, T, N, F) or (..., c_in); params from init_data_embedding_params.
    """
    c_in, d_model, r = params["c_in"], params["d_model"], params["r"]

    if x.ndim == 4:
        B, T, N, F = x.shape
        x = x.reshape(B, T, N * F)
    *lead, last = x.shape
    assert last == c_in, f"expected last dim {c_in}, got {last}"

    x2 = x.reshape(-1, c_in)
    M = x2.shape[0]

    # Lane-dense output path: view x as (M//r, r*c_in) and matmul against the
    # block-diagonal weight so the output slab last dim is 128.
    use_slab = (r > 1) and (M % r == 0)
    if use_slab:
        xk = x2.reshape(M // r, r * c_in)   # free row-major view
        w, b = params["w_slab"], params["b_slab"]
    else:
        xk = x2
        w, b = params["w"], params["b"]

    Mk, Kk = xk.shape
    Nk = w.shape[1]

    in_sz = jnp.dtype(xk.dtype).itemsize
    out_sz = jnp.dtype(x.dtype).itemsize
    tm, vmem_est = _pick_tile(Mk, Kk, Nk, in_sz, out_sz)
    grid = (pl.cdiv(Mk, tm),)           # ragged last block clipped by Pallas
    vmem_limit = int(min(100 * 2**20, max(32 * 2**20, 2 * vmem_est)))

    out = pl.pallas_call(
        _linear_kernel,
        out_shape=jax.ShapeDtypeStruct((Mk, Nk), x.dtype),
        grid_spec=pltpu.PrefetchScalarGridSpec(
            num_scalar_prefetch=0,
            grid=grid,
            in_specs=[
                # activations: one row-tile per grid step (streamed)
                pl.BlockSpec((tm, Kk), lambda i: (i, 0)),
                # weight / bias: constant index_map -> stay VMEM-resident.
                # (pl.Buffered(1) would halve their footprint; left at the
                # default for lowering compatibility.)
                pl.BlockSpec((Kk, Nk), lambda i: (0, 0)),
                pl.BlockSpec((1, Nk), lambda i: (0, 0)),
            ],
            out_specs=pl.BlockSpec((tm, Nk), lambda i: (i, 0)),
        ),
        compiler_params=pltpu.CompilerParams(
            dimension_semantics=("parallel",),
            vmem_limit_bytes=vmem_limit,
        ),
        cost_estimate=pl.CostEstimate(
            flops=2 * Mk * Kk * Nk,
            transcendentals=0,
            bytes_accessed=in_sz * (Mk * Kk + Kk * Nk + Nk) + out_sz * Mk * Nk,
        ),
    )(xk, w, b)

    if use_slab:
        out = out.reshape(M, d_model)   # free row-major view back
    # TODO(synk): training-mode dropout (p=0.05) omitted -- eval-mode forward
    # is identity; would be fused into the epilogue via pltpu.prng_seed +
    # pltpu.prng_random_bits with 1/(1-p) inverted-dropout scaling.
    return out.reshape(*lead, d_model)


if __name__ == "__main__":
    key = jax.random.PRNGKey(0)
    B, T, N, F = 2, 8, 4, 4
    c_in = N * F            # 16
    d_model = 32

    k_x, k_w, k_b, k_x3, k_x5 = jax.random.split(key, 5)
    x4 = jax.random.normal(k_x, (B, T, N, F), jnp.float32)
    weight = jax.random.normal(k_w, (d_model, c_in), jnp.float32) * 0.1
    bias = jax.random.normal(k_b, (d_model,), jnp.float32) * 0.1

    params = init_data_embedding_params(weight, bias)

    # 4-D input path (lane-dense slab path: M = 16, r = 4)
    out4 = jax.block_until_ready(data_embedding_forward(x4, params))
    ref4 = x4.reshape(B, T, c_in) @ weight.T + bias
    assert out4.shape == (B, T, d_model)
    assert bool(jnp.allclose(out4, ref4, atol=1e-3, rtol=1e-3))

    # 3-D input path
    x3 = jax.random.normal(k_x3, (B, T, c_in), jnp.float32)
    out3 = jax.block_until_ready(data_embedding_forward(x3, params))
    ref3 = x3 @ weight.T + bias
    assert out3.shape == (B, T, d_model)
    assert bool(jnp.allclose(out3, ref3, atol=1e-3, rtol=1e-3))

    # fallback path: M = 5 is not a multiple of r=4 -> direct (M, d_model)
    # output and a ragged last grid block (rows 5..7 never written back).
    x5 = jax.random.normal(k_x5, (1, 5, c_in), jnp.float32)
    out5 = jax.block_until_ready(data_embedding_forward(x5, params))
    ref5 = x5 @ weight.T + bias
    assert out5.shape == (1, 5, d_model)
    assert bool(jnp.allclose(out5, ref5, atol=1e-3, rtol=1e-3))

    print("KERNEL_OK")
</pallas_src>

<mosaic_0001>
module attributes {stable_mosaic.version = 11 : i64} {
  func.func @_linear_kernel(%arg0: i32, %arg1: memref<8x64xf32, #tpu.memory_space<vmem>>, %arg2: memref<64x128xf32, #tpu.memory_space<vmem>>, %arg3: memref<1x128xf32, #tpu.memory_space<vmem>>, %arg4: memref<8x128xf32, #tpu.memory_space<vmem>>) attributes {dimension_semantics = [#tpu.dimension_semantics<parallel>], iteration_bounds = array<i64: 1>, scalar_prefetch = 0 : i64, scratch_operands = 0 : i64, tpu.core_type = #tpu.core_type<tc>, window_params = [{transform_indices = @transform_0, window_bounds = array<i64: 8, 64>}, {pipeline_mode = #tpu.pipeline_mode<synchronous>, transform_indices = @transform_1, window_bounds = array<i64: 64, 128>}, {pipeline_mode = #tpu.pipeline_mode<synchronous>, transform_indices = @transform_2, window_bounds = array<i64: 1, 128>}, {transform_indices = @transform_3, window_bounds = array<i64: 8, 128>}]} {
    %c0 = arith.constant 0 : index
    %c0_0 = arith.constant 0 : index
    %0 = vector.load %arg1[%c0, %c0_0] : memref<8x64xf32, #tpu.memory_space<vmem>>, vector<8x64xf32>
    %c0_1 = arith.constant 0 : index
    %c0_2 = arith.constant 0 : index
    %1 = vector.load %arg2[%c0_1, %c0_2] : memref<64x128xf32, #tpu.memory_space<vmem>>, vector<64x128xf32>
    %cst = arith.constant dense<0.000000e+00> : vector<8x128xf32>
    %2 = tpu.matmul %0, %1, %cst {dimension_numbers = #tpu.dot_dimension_numbers<[1], [0], [0], [1], [0, 0, 1, 1], [], []>} : vector<8x64xf32>, vector<64x128xf32>, vector<8x128xf32> -> vector<8x128xf32>
    %c0_3 = arith.constant 0 : index
    %c0_4 = arith.constant 0 : index
    %3 = vector.load %arg3[%c0_3, %c0_4] : memref<1x128xf32, #tpu.memory_space<vmem>>, vector<1x128xf32>
    %4 = vector.broadcast %3 : vector<1x128xf32> to vector<8x128xf32>
    %5 = arith.addf %2, %4 : vector<8x128xf32>
    %c0_5 = arith.constant 0 : index
    %c0_6 = arith.constant 0 : index
    %6 = vector.load %arg4[%c0_5, %c0_6] : memref<8x128xf32, #tpu.memory_space<vmem>>, vector<8x128xf32>
    tpu.vector_store %arg4[%c0_5, %c0_6], %5 {strides = array<i32>} : memref<8x128xf32, #tpu.memory_space<vmem>>, vector<8x128xf32>,
    return
  }
  func.func @transform_0(%arg0: i32) -> (i32, i32) {
    %c0_i32 = arith.constant 0 : i32
    %c0_i32_0 = arith.constant 0 : i32
    return %arg0, %c0_i32 : i32, i32
  }
  func.func @transform_1(%arg0: i32) -> (i32, i32) {
    %c0_i32 = arith.constant 0 : i32
    %c0_i32_0 = arith.constant 0 : i32
    %c0_i32_1 = arith.constant 0 : i32
    return %c0_i32, %c0_i32_0 : i32, i32
  }
  func.func @transform_2(%arg0: i32) -> (i32, i32) {
    %c0_i32 = arith.constant 0 : i32
    %c0_i32_0 = arith.constant 0 : i32
    %c0_i32_1 = arith.constant 0 : i32
    return %c0_i32, %c0_i32_0 : i32, i32
  }
  func.func @transform_3(%arg0: i32) -> (i32, i32) {
    %c0_i32 = arith.constant 0 : i32
    %c0_i32_0 = arith.constant 0 : i32
    return %arg0, %c0_i32 : i32, i32
  }
}

</mosaic_0001>

<bundles_post_ra>
// kernel: tpu_custom_call.1
= control target key start
LH: loop header
LB: loop body
LE: loop exit
PB: predicated region body
PF: predicated region fallthrough
CT: control target
= control target key end

     0   :  { %8 = vsyncpa [#allocation3], 0  ;;  %s351_s0 = inlined_call_operand.hbm [shape: f32[4,64], index: 0, kind: input, shape index: {}]   ;;  %s352_s1 = inlined_call_operand.hbm [shape: f32[64,128], index: 1, kind: input, shape index: {}]   ;;  %s353_s2 = inlined_call_operand.vmem [shape: f32[1,128], index: 2, kind: input, shape index: {}]   ;;  %s354_s3 = inlined_call_operand.hbm [shape: f32[4,128], index: 3, kind: output, shape index: {}]  }
   0x1   :  { %9 = vsyncpa [#allocation6], 0 }
   0x2   :  { %10 = vsyncpa [#allocation4], 0 }
   0x3   :  { %15 = vsyncadd [#allocation3], 64  ;;  %s276_s12 = smov [#allocation2]   ;;  %s204_s16 = scalar_lea.hbm %s351_s0, 64 }
   0x4   :  { %s16_s13 = sshll.u32 %s276_s12, 4  ;;  %p205_p0 = scmp.ne.s32.totalorder %s351_s0, %s204_s16  ;;  %s17_s13 = int_to_ptr.vmem [resolvable:$true] %s16_s13 }
   0x5   :  { %p208_p1 = scmp.lt.u32.totalorder %s204_s16, %s351_s0 }
   0x7   :  { %p210_p2 = pnand %p208_p1, %p205_p0 }
   0x9   :  { %213 = shalt.err (!%p210_p2)
}
   0xa   :  { %s214_s21 = scalar_lea.vmem %s17_s13, 64  ;;  %s218_s22 = scalar_lea.vmem %s17_s13, 128 }
   0xb   :  { %p215_p3 = scmp.ne.s32.totalorder %s17_s13, %s214_s21  ;;  %p219_p4 = scmp.lt.s32.totalorder %s17_s13, %s17_s13 }
   0xc   :  { %p220_p5 = scmp.lt.s32.totalorder %s218_s22, %s214_s21 }
   0xe   :  { %p221_p6 = por %p220_p5, %p219_p4 }
  0x10   :  { %p222_p7 = pnand %p221_p6, %p215_p3 }
  0x12   :  { %225 = shalt.err (!%p222_p7)
}
  0x13   :  { %s277_s23 = smov 64   ;;  %s278_s24 = smov 4  }
  0x14   :  { %22 = dma.hbm_to_vmem [thread:$0]  %s351_s0, 64, %s17_s13, [#allocation3], %s277_s23, %s277_s23, %s278_s24  }
  0x15   :  { %s279_s27 = smov [#allocation5]   ;;  %s226_s4 = scalar_lea.hbm %s352_s1, 1024 }
  0x16   :  { %s28_s28 = sshll.u32 %s279_s27, 4  ;;  %p227_p8 = scmp.ne.s32.totalorder %s352_s1, %s226_s4  ;;  %s29_s28 = int_to_ptr.vmem [resolvable:$true] %s28_s28 }
  0x17   :  { %p230_p9 = scmp.lt.u32.totalorder %s226_s4, %s352_s1 }
  0x19   :  { %p232_p10 = pnand %p230_p9, %p227_p8 }
  0x1b   :  { %235 = shalt.err (!%p232_p10)
}
  0x1c   :  { %s236_s9 = scalar_lea.vmem %s29_s28, 1024  ;;  %p241_p12 = scmp.lt.s32.totalorder %s29_s28, %s29_s28 }
  0x1d   :  { %p237_p11 = scmp.ne.s32.totalorder %s29_s28, %s236_s9  ;;  %p242_p13 = scmp.lt.s32.totalorder %s236_s9, %s236_s9 }
  0x1f   :  { %p243_p0 = por %p242_p13, %p241_p12 }
  0x21   :  { %p244_p1 = pnand %p243_p0, %p237_p11 }
  0x23   :  { %247 = shalt.err (!%p244_p1)
}
  0x24   :  { %s280_s0 = smov 128   ;;  %s281_s10 = smov 8  }
  0x25   :  { %34 = dma.hbm_to_vmem [thread:$0]  %s352_s1, 1024, %s29_s28, [#allocation6], %s280_s0, %s280_s0, %s281_s10  }
  0x26   :  { %270 = dma.done.wait [#allocation3], 128  }
  0x27   :  { %271 = vsyncadd [#allocation3], 4294967168 }
  0x28   :  { %272 = dma.done.wait [#allocation6], 1024  }
  0x29   :  { %273 = vsyncadd [#allocation6], 4294966272  ;;  %v282_v0 = vmov 0.0|0.0   ;;  %vm283_vm0 = vmmov 0   ;;  %v284_v1 = vmov 0.0   ;;  %v44_v2 = vld [vmem:[#allocation5] sm:$0xff] }
  0x2a   :  { %182 = vmatprep.subr.bf16.mxu0 %v282_v0  ;;  %179 = vmatprep.mubr.msk.f32.mxu0 %vm283_vm0, %v284_v1  ;;  %v45_v3 = vld [vmem:[#allocation5 + $0x8] sm:$0xff]  ;;  %v46_v4 = vld [vmem:[#allocation5 + $0x10] sm:$0xff]  ;;  %v47_v6 = vld [vmem:[#allocation5 + $0x18] sm:$0xff]  ;;  %vm59_vm1 = vcmask 523264  }
  0x2b   :  { %v183_v5 = vpack.c.bf16 %v45_v3, %v44_v2  ;;  %v186_v7 = vpack.c.bf16 %v47_v6, %v46_v4  ;;  %v48_v8 = vld [vmem:[#allocation5 + $0x20] sm:$0xff]  ;;  %v49_v9 = vld [vmem:[#allocation5 + $0x28] sm:$0xff]  ;;  %v50_v11 = vld [vmem:[#allocation5 + $0x30] sm:$0xff] }
  0x2c   :  { %v189_v10 = vpack.c.bf16 %v49_v9, %v48_v8  ;;  %v51_v12 = vld [vmem:[#allocation5 + $0x38] sm:$0xff] }
  0x2d   :  { %184 = vmatpush3.bf16.msra.mxu0 %v183_v5  ;;  %v192_v13 = vpack.c.bf16 %v51_v12, %v50_v11  ;;  %v43_v14 = vld [vmem:[#allocation2] sm:$0xff] }
  0x2e   :  { %185 = vmatprep.subr.bf16.mxu0 %v282_v0  ;;  %v152_v15 = vld [vmem:[%s353_s2] ss:$0 sm:$0xff] }
  0x31   :  { %187 = vmatpush3.bf16.msra.mxu0 %v186_v7 }
  0x32   :  { %188 = vmatprep.subr.bf16.mxu0 %v282_v0 }
  0x35   :  { %190 = vmatpush3.bf16.msra.mxu0 %v189_v10 }
  0x36   :  { %191 = vmatprep.subr.bf16.mxu0 %v282_v0 }
  0x39   :  { %193 = vmatpush3.bf16.msra.mxu0 %v192_v13 }
  0x3c   :  { %180 = vmatmul.mubr.msk.f32.vlgmr.msra.gmra.mrb[0].mxu0 %vm59_vm1, %v43_v14 }
 0x10f   :  { %v129_v16 = vpop.f32.mrb[0].mxu0 }
 0x110   :  { %v130_v17 = vadd.f32 %v152_v15, %v129_v16  ;;  %v181_v18 = vpop.f32.mrb[1].mxu0 }
 0x112   :  { %133 = vst [vmem:[#allocation7] sm:$0xff] %v130_v17 }
 0x113   :  { %138 = vsyncadd [#allocation4], 64  ;;  %s285_s14 = smov [#allocation7]  }
 0x114   :  { %s139_s15 = sshll.u32 %s285_s14, 4  ;;  %s140_s15 = int_to_ptr.vmem [resolvable:$true] %s139_s15 }
 0x115   :  { %s248_s16 = scalar_lea.vmem %s140_s15, 64  ;;  %s252_s17 = scalar_lea.vmem %s140_s15, 128 }
 0x116   :  { %p249_p2 = scmp.ne.s32.totalorder %s140_s15, %s248_s16  ;;  %p253_p3 = scmp.lt.s32.totalorder %s140_s15, %s140_s15 }
 0x117   :  { %p254_p4 = scmp.lt.s32.totalorder %s252_s17, %s248_s16 }
 0x119   :  { %p255_p5 = por %p254_p4, %p253_p3 }
 0x11b   :  { %p256_p6 = pnand %p255_p5, %p249_p2 }
 0x11d   :  { %259 = shalt.err (!%p256_p6)
}
 0x11e   :  { %s260_s2 = scalar_lea.hbm %s354_s3, 64 }
 0x11f   :  { %p261_p7 = scmp.ne.s32.totalorder %s354_s3, %s260_s2  ;;  %p264_p8 = scmp.lt.u32.totalorder %s260_s2, %s354_s3 }
 0x121   :  { %p266_p9 = pnand %p264_p8, %p261_p7 }
 0x123   :  { %269 = shalt.err (!%p266_p9)
}
 0x124   :  { %145 = dma.vmem_to_hbm [thread:$0]  %s140_s15, 64, %s354_s3, [#allocation4], %s277_s23, %s277_s23, %s278_s24  }
 0x125   :  { %274 = dma.done.wait [#allocation4], 128  }
 0x126   :  { %275 = vsyncadd [#allocation4], 4294967168 }
 0x127   :  { %149 = vsyncpa [#allocation3], 1 }
 0x128   :  { %150 = vsyncpa [#allocation6], 1 }
 0x129   :  { %151 = vsyncpa [#allocation4], 1 }

</bundles_post_ra>
